<compile_context>
chip_gen: v5e
topology: v5e:2x2
jax: 0.10.0
libtpu: 0.0.40
codegen_flags: <defaults>
</compile_context>

<pallas_src>
import jax
import jax.numpy as jnp
from jax.experimental import pallas as pl
from jax.experimental.pallas import tpu as pltpu

KH = KW = 3  # kernel_size=3


def _make_condconv_kernel(batch_block: int, num_experts: int):
    def kernel(rw_ref, ew_ref, bias_ref, p_ref, o_ref):
        """Fused routing-mix + conditional 3x3 VALID conv for `batch_block` samples.

        rw_ref:   (B, E)        SMEM routing weights (post-sigmoid), read as scalars
        ew_ref:   (E, Cout, K)  VMEM expert kernels, resident across grid steps
        bias_ref: (Cout, 1)     VMEM conv bias
        p_ref:    (bb, K, P)    VMEM im2col patches for this grid step
        o_ref:    (bb, Cout, P) VMEM output (lane-dense rows of length P)
        """
        step = pl.program_id(0)
        for i in range(batch_block):  # static unroll (batch_block is tiny)
            b = step * batch_block + i
            # Expert mixing: E tiny VPU scaled-adds over a (Cout, K) tile.
            w = rw_ref[b, 0] * ew_ref[0]
            for e in range(1, num_experts):
                w = w + rw_ref[b, e] * ew_ref[e]
            # One MXU matmul per sample: (Cout, K) x (K, P) -> (Cout, P).
            acc = jnp.dot(w, p_ref[i], preferred_element_type=jnp.float32)
            o_ref[i] = (acc + bias_ref[...]).astype(o_ref.dtype)

    return kernel


def _pick_batch_block(B: int) -> int:
    """One batch element per grid step on multi-TC chips (v7x / megacore) so the
    'parallel' axis shards across cores; collapse the grid on single-TC chips
    (v5e/v6e) where grid=(B,) is just a serial loop paying per-step overhead."""
    try:
        kind = jax.devices()[0].device_kind.lower()
    except Exception:
        return 1
    multi_tc = any(tag in kind for tag in ("v7", "v4", "v5p"))
    return 1 if (multi_tc and B > 1) else B


def condconv2d_forward(x, expert_w, conv_bias, fc_w, fc_b):
    """x: (B, 1, H, W) float32 NCHW. Returns (B, 128, H-2, W-2) NCHW."""
    B, Cin, H, W = x.shape
    E, Cout = expert_w.shape[0], expert_w.shape[1]
    Hout, Wout = H - KH + 1, W - KW + 1
    P = Hout * Wout
    K = KH * KW

    # --- routing (tiny glue): adaptive_avg_pool2d((1,1)) -> flatten ->
    #     Dropout(eval: identity) -> Linear(Cin -> E) -> sigmoid ---
    pooled = jnp.mean(x, axis=(2, 3))                 # (B, Cin)
    rw = jax.nn.sigmoid(pooled @ fc_w.T + fc_b)       # (B, E)

    # Expert kernels laid out for the in-kernel mix + (Cout,K)x(K,P) matmul.
    ew = expert_w.reshape(E, Cout, Cin * KH * KW)     # (E, Cout, 9); Cin == 1
    bias = conv_bias.reshape(Cout, 1)                 # (Cout, 1)

    # im2col as (B, K, P): row k = (kh, kw)-shifted window, flattened spatially.
    x_sq = x[:, 0, :, :]
    patches = jnp.stack(
        [x_sq[:, kh:kh + Hout, kw:kw + Wout].reshape(B, P)
         for kh in range(KH) for kw in range(KW)],
        axis=1,
    )                                                  # (B, K, P)
    # TODO(synk): fusing im2col into the kernel (x as a (1,H,W) VMEM block + static
    # slices) would drop the last sizeable XLA op; only worth it if still dispatch-bound.

    bb = _pick_batch_block(B)
    grid = (B // bb,)

    out_flat = pl.pallas_call(
        _make_condconv_kernel(bb, E),
        out_shape=jax.ShapeDtypeStruct((B, Cout, P), x.dtype),
        grid_spec=pltpu.PrefetchScalarGridSpec(
            num_scalar_prefetch=0,
            grid=grid,
            in_specs=[
                # routing weights: whole (B, E) array resident in SMEM
                pl.BlockSpec(memory_space=pltpu.MemorySpace.SMEM),
                # expert kernels: constant block index -> fetched once, stays in VMEM
                pl.BlockSpec((E, Cout, K), lambda s: (0, 0, 0)),
                # conv bias (broadcast over the P lanes in-kernel)
                pl.BlockSpec((Cout, 1), lambda s: (0, 0)),
                # im2col patches for this batch block
                pl.BlockSpec((bb, K, P), lambda s: (s, 0, 0)),
            ],
            out_specs=pl.BlockSpec((bb, Cout, P), lambda s: (s, 0, 0)),
        ),
        compiler_params=pltpu.CompilerParams(
            dimension_semantics=("parallel",)),
    )(rw, ew, bias, patches)

    # (B, Cout, P) -> (B, Cout, Hout, Wout): pure reshape, no transpose.
    return out_flat.reshape(B, Cout, Hout, Wout)


def reference_forward(x, expert_w, conv_bias, fc_w, fc_b):
    """Pure-JAX reference mirroring the PyTorch forward (for validation)."""
    B = x.shape[0]
    pooled = jnp.mean(x, axis=(2, 3))
    rw = jax.nn.sigmoid(pooled @ fc_w.T + fc_b)
    mixed = jnp.einsum('be,eoikl->boikl', rw, expert_w)
    outs = []
    for b in range(B):
        o = jax.lax.conv_general_dilated(
            x[b:b + 1], mixed[b], window_strides=(1, 1), padding='VALID',
            dimension_numbers=('NCHW', 'OIHW', 'NCHW'))
        outs.append(o + conv_bias[None, :, None, None])
    return jnp.concatenate(outs, axis=0)


if __name__ == "__main__":
    key = jax.random.PRNGKey(0)
    k1, k2, k3, k4, k5 = jax.random.split(key, 5)

    B, Cin, H, W = 2, 1, 16, 16
    E, Cout = 3, 128

    # Deterministic synthetic parameters (shapes from CondConv2D.__init__)
    expert_w = jax.random.normal(k1, (E, Cout, Cin, KH, KW), jnp.float32) * 0.1
    conv_bias = jax.random.normal(k2, (Cout,), jnp.float32) * 0.1
    fc_w = jax.random.normal(k3, (E, Cin), jnp.float32) * 0.5   # routing Linear(Cin -> E)
    fc_b = jax.random.normal(k4, (E,), jnp.float32) * 0.5

    x = jax.random.normal(k5, (B, Cin, H, W), jnp.float32)

    fwd = jax.jit(condconv2d_forward)
    out = jax.block_until_ready(fwd(x, expert_w, conv_bias, fc_w, fc_b))

    ref = jax.block_until_ready(reference_forward(x, expert_w, conv_bias, fc_w, fc_b))

    assert out.shape == (B, Cout, H - 2, W - 2), out.shape
    max_err = float(jnp.max(jnp.abs(out - ref)))
    assert jnp.allclose(out, ref, atol=1e-4, rtol=1e-4), max_err

    print("KERNEL_OK")
</pallas_src>

<mosaic_0001>
module attributes {stable_mosaic.version = 11 : i64} {
  func.func @kernel(%arg0: i32, %arg1: memref<2x3xf32, #tpu.memory_space<smem>>, %arg2: memref<3x128x9xf32, #tpu.memory_space<vmem>>, %arg3: memref<128x1xf32, #tpu.memory_space<vmem>>, %arg4: memref<2x9x196xf32, #tpu.memory_space<vmem>>, %arg5: memref<2x128x196xf32, #tpu.memory_space<vmem>>) attributes {dimension_semantics = [#tpu.dimension_semantics<parallel>], iteration_bounds = array<i64: 1>, scalar_prefetch = 0 : i64, scratch_operands = 0 : i64, tpu.core_type = #tpu.core_type<tc>, window_params = [{transform_indices = @transform_0, window_bounds = array<i64: 2, 3>}, {pipeline_mode = #tpu.pipeline_mode<synchronous>, transform_indices = @transform_1, window_bounds = array<i64: 3, 128, 9>}, {pipeline_mode = #tpu.pipeline_mode<synchronous>, transform_indices = @transform_2, window_bounds = array<i64: 128, 1>}, {transform_indices = @transform_3, window_bounds = array<i64: 2, 9, 196>}, {transform_indices = @transform_4, window_bounds = array<i64: 2, 128, 196>}]} {
    %c2_i32 = arith.constant 2 : i32
    %0 = arith.muli %arg0, %c2_i32 : i32
    %c0_i32 = arith.constant 0 : i32
    %1 = arith.addi %0, %c0_i32 : i32
    %2 = arith.index_cast %1 : i32 to index
    %c0 = arith.constant 0 : index
    %3 = memref.load %arg1[%2, %c0] : memref<2x3xf32, #tpu.memory_space<smem>>
    %c0_0 = arith.constant 0 : index
    %c0_1 = arith.constant 0 : index
    %c0_2 = arith.constant 0 : index
    %4 = vector.load %arg2[%c0_0, %c0_1, %c0_2] : memref<3x128x9xf32, #tpu.memory_space<vmem>>, vector<1x128x9xf32>
    %5 = vector.shape_cast %4 : vector<1x128x9xf32> to vector<128x9xf32>
    %6 = vector.broadcast %3 : f32 to vector<128x9xf32>
    %7 = arith.mulf %6, %5 : vector<128x9xf32>
    %8 = arith.index_cast %1 : i32 to index
    %c1 = arith.constant 1 : index
    %9 = memref.load %arg1[%8, %c1] : memref<2x3xf32, #tpu.memory_space<smem>>
    %c1_3 = arith.constant 1 : index
    %c0_4 = arith.constant 0 : index
    %c0_5 = arith.constant 0 : index
    %10 = vector.load %arg2[%c1_3, %c0_4, %c0_5] : memref<3x128x9xf32, #tpu.memory_space<vmem>>, vector<1x128x9xf32>
    %11 = vector.shape_cast %10 : vector<1x128x9xf32> to vector<128x9xf32>
    %12 = vector.broadcast %9 : f32 to vector<128x9xf32>
    %13 = arith.mulf %12, %11 : vector<128x9xf32>
    %14 = arith.addf %7, %13 : vector<128x9xf32>
    %15 = arith.index_cast %1 : i32 to index
    %c2 = arith.constant 2 : index
    %16 = memref.load %arg1[%15, %c2] : memref<2x3xf32, #tpu.memory_space<smem>>
    %c2_6 = arith.constant 2 : index
    %c0_7 = arith.constant 0 : index
    %c0_8 = arith.constant 0 : index
    %17 = vector.load %arg2[%c2_6, %c0_7, %c0_8] : memref<3x128x9xf32, #tpu.memory_space<vmem>>, vector<1x128x9xf32>
    %18 = vector.shape_cast %17 : vector<1x128x9xf32> to vector<128x9xf32>
    %19 = vector.broadcast %16 : f32 to vector<128x9xf32>
    %20 = arith.mulf %19, %18 : vector<128x9xf32>
    %21 = arith.addf %14, %20 : vector<128x9xf32>
    %c0_9 = arith.constant 0 : index
    %c0_10 = arith.constant 0 : index
    %c0_11 = arith.constant 0 : index
    %22 = vector.load %arg4[%c0_9, %c0_10, %c0_11] : memref<2x9x196xf32, #tpu.memory_space<vmem>>, vector<1x9x196xf32>
    %23 = vector.shape_cast %22 : vector<1x9x196xf32> to vector<9x196xf32>
    %cst = arith.constant dense<0.000000e+00> : vector<128x196xf32>
    %24 = tpu.matmul %21, %23, %cst {dimension_numbers = #tpu.dot_dimension_numbers<[1], [0], [0], [1], [0, 0, 1, 1], [], []>} : vector<128x9xf32>, vector<9x196xf32>, vector<128x196xf32> -> vector<128x196xf32>
    %c0_12 = arith.constant 0 : index
    %c0_13 = arith.constant 0 : index
    %25 = vector.load %arg3[%c0_12, %c0_13] : memref<128x1xf32, #tpu.memory_space<vmem>>, vector<128x1xf32>
    %26 = vector.broadcast %25 : vector<128x1xf32> to vector<128x196xf32>
    %27 = arith.addf %24, %26 : vector<128x196xf32>
    %c0_14 = arith.constant 0 : index
    %c0_15 = arith.constant 0 : index
    %c0_16 = arith.constant 0 : index
    %28 = vector.load %arg5[%c0_14, %c0_15, %c0_16] : memref<2x128x196xf32, #tpu.memory_space<vmem>>, vector<1x128x196xf32>
    %29 = vector.shape_cast %28 : vector<1x128x196xf32> to vector<128x196xf32>
    %30 = vector.shape_cast %27 : vector<128x196xf32> to vector<1x128x196xf32>
    tpu.vector_store %arg5[%c0_14, %c0_15, %c0_16], %30 {strides = array<i32>} : memref<2x128x196xf32, #tpu.memory_space<vmem>>, vector<1x128x196xf32>,
    %c2_i32_17 = arith.constant 2 : i32
    %31 = arith.muli %arg0, %c2_i32_17 : i32
    %c1_i32 = arith.constant 1 : i32
    %32 = arith.addi %31, %c1_i32 : i32
    %33 = arith.index_cast %32 : i32 to index
    %c0_18 = arith.constant 0 : index
    %34 = memref.load %arg1[%33, %c0_18] : memref<2x3xf32, #tpu.memory_space<smem>>
    %c0_19 = arith.constant 0 : index
    %c0_20 = arith.constant 0 : index
    %c0_21 = arith.constant 0 : index
    %35 = vector.load %arg2[%c0_19, %c0_20, %c0_21] : memref<3x128x9xf32, #tpu.memory_space<vmem>>, vector<1x128x9xf32>
    %36 = vector.shape_cast %35 : vector<1x128x9xf32> to vector<128x9xf32>
    %37 = vector.broadcast %34 : f32 to vector<128x9xf32>
    %38 = arith.mulf %37, %36 : vector<128x9xf32>
    %39 = arith.index_cast %32 : i32 to index
    %c1_22 = arith.constant 1 : index
    %40 = memref.load %arg1[%39, %c1_22] : memref<2x3xf32, #tpu.memory_space<smem>>
    %c1_23 = arith.constant 1 : index
    %c0_24 = arith.constant 0 : index
    %c0_25 = arith.constant 0 : index
    %41 = vector.load %arg2[%c1_23, %c0_24, %c0_25] : memref<3x128x9xf32, #tpu.memory_space<vmem>>, vector<1x128x9xf32>
    %42 = vector.shape_cast %41 : vector<1x128x9xf32> to vector<128x9xf32>
    %43 = vector.broadcast %40 : f32 to vector<128x9xf32>
    %44 = arith.mulf %43, %42 : vector<128x9xf32>
    %45 = arith.addf %38, %44 : vector<128x9xf32>
    %46 = arith.index_cast %32 : i32 to index
    %c2_26 = arith.constant 2 : index
    %47 = memref.load %arg1[%46, %c2_26] : memref<2x3xf32, #tpu.memory_space<smem>>
    %c2_27 = arith.constant 2 : index
    %c0_28 = arith.constant 0 : index
    %c0_29 = arith.constant 0 : index
    %48 = vector.load %arg2[%c2_27, %c0_28, %c0_29] : memref<3x128x9xf32, #tpu.memory_space<vmem>>, vector<1x128x9xf32>
    %49 = vector.shape_cast %48 : vector<1x128x9xf32> to vector<128x9xf32>
    %50 = vector.broadcast %47 : f32 to vector<128x9xf32>
    %51 = arith.mulf %50, %49 : vector<128x9xf32>
    %52 = arith.addf %45, %51 : vector<128x9xf32>
    %c1_30 = arith.constant 1 : index
    %c0_31 = arith.constant 0 : index
    %c0_32 = arith.constant 0 : index
    %53 = vector.load %arg4[%c1_30, %c0_31, %c0_32] : memref<2x9x196xf32, #tpu.memory_space<vmem>>, vector<1x9x196xf32>
    %54 = vector.shape_cast %53 : vector<1x9x196xf32> to vector<9x196xf32>
    %cst_33 = arith.constant dense<0.000000e+00> : vector<128x196xf32>
    %55 = tpu.matmul %52, %54, %cst_33 {dimension_numbers = #tpu.dot_dimension_numbers<[1], [0], [0], [1], [0, 0, 1, 1], [], []>} : vector<128x9xf32>, vector<9x196xf32>, vector<128x196xf32> -> vector<128x196xf32>
    %c0_34 = arith.constant 0 : index
    %c0_35 = arith.constant 0 : index
    %56 = vector.load %arg3[%c0_34, %c0_35] : memref<128x1xf32, #tpu.memory_space<vmem>>, vector<128x1xf32>
    %57 = vector.broadcast %56 : vector<128x1xf32> to vector<128x196xf32>
    %58 = arith.addf %55, %57 : vector<128x196xf32>
    %c1_36 = arith.constant 1 : index
    %c0_37 = arith.constant 0 : index
    %c0_38 = arith.constant 0 : index
    %59 = vector.load %arg5[%c1_36, %c0_37, %c0_38] : memref<2x128x196xf32, #tpu.memory_space<vmem>>, vector<1x128x196xf32>
    %60 = vector.shape_cast %59 : vector<1x128x196xf32> to vector<128x196xf32>
    %61 = vector.shape_cast %58 : vector<128x196xf32> to vector<1x128x196xf32>
    tpu.vector_store %arg5[%c1_36, %c0_37, %c0_38], %61 {strides = array<i32>} : memref<2x128x196xf32, #tpu.memory_space<vmem>>, vector<1x128x196xf32>,
    return
  }
  func.func @transform_0(%arg0: i32) -> (i32, i32) {
    %c0_i32 = arith.constant 0 : i32
    %c0_i32_0 = arith.constant 0 : i32
    %c0_i32_1 = arith.constant 0 : i32
    return %c0_i32, %c0_i32_0 : i32, i32
  }
  func.func @transform_1(%arg0: i32) -> (i32, i32, i32) {
    %c0_i32 = arith.constant 0 : i32
    %c0_i32_0 = arith.constant 0 : i32
    %c0_i32_1 = arith.constant 0 : i32
    %c0_i32_2 = arith.constant 0 : i32
    return %c0_i32, %c0_i32_0, %c0_i32_1 : i32, i32, i32
  }
  func.func @transform_2(%arg0: i32) -> (i32, i32) {
    %c0_i32 = arith.constant 0 : i32
    %c0_i32_0 = arith.constant 0 : i32
    %c0_i32_1 = arith.constant 0 : i32
    return %c0_i32, %c0_i32_0 : i32, i32
  }
  func.func @transform_3(%arg0: i32) -> (i32, i32, i32) {
    %c0_i32 = arith.constant 0 : i32
    %c0_i32_0 = arith.constant 0 : i32
    %c0_i32_1 = arith.constant 0 : i32
    return %arg0, %c0_i32, %c0_i32_0 : i32, i32, i32
  }
  func.func @transform_4(%arg0: i32) -> (i32, i32, i32) {
    %c0_i32 = arith.constant 0 : i32
    %c0_i32_0 = arith.constant 0 : i32
    %c0_i32_1 = arith.constant 0 : i32
    return %arg0, %c0_i32, %c0_i32_0 : i32, i32, i32
  }
}

</mosaic_0001>

<bundles_post_ra>
// kernel: condconv2d_forward.1
= control target key start
LH: loop header
LB: loop body
LE: loop exit
PB: predicated region body
PF: predicated region fallthrough
CT: control target
= control target key end

     0   :  { %9 = vsyncpa [#allocation3], 0  ;;  %s1142_s18 = smov [#allocation2]   ;;  %s1908_s0 = inlined_call_operand.vmem [shape: f32[2,3], index: 0, kind: input, shape index: {}]   ;;  %s1909_s1 = inlined_call_operand.vmem [shape: f32[3,128,9], index: 1, kind: input, shape index: {}]   ;;  %s1910_s2 = inlined_call_operand.vmem [shape: f32[128,1], index: 2, kind: input, shape index: {}]   ;;  %s1911_s3 = inlined_call_operand.vmem [shape: f32[2,9,196], index: 3, kind: input, shape index: {}]   ;;  %s1912_s4 = inlined_call_operand.vmem [shape: f32[2,128,196], index: 4, kind: output, shape index: {}]  }
   0x1   :  { %s15_s17 = sshll.u32 %s1908_s0, 4  ;;  %s16_s17 = int_to_ptr.vmem [resolvable:$true] %s15_s17 }
   0x2   :  { %18 = dma.vmem_to_smem %s16_s17, 32, %s1142_s18, [#allocation3]  }
   0x3   :  { %1140 = dma.done.wait [#allocation3], 32  }
   0x4   :  { %1141 = vsyncadd [#allocation3], 4294967264 }
   0x5   :  { %29 = sfence }
   0x6   :  { %v1175_v0 = vld [vmem:[%s1910_s2 + $0x10] sm:$0xff]  ;;  %v1180_v1 = vld [vmem:[%s1910_s2] sm:$0xff]  ;;  %vm319_vm0 = vcmask 1040384   ;;  %v1143_v3 = vmov 0   ;;  %v1056_v4 = vld [vmem:[%s1911_s3 + $0x38] sm:$0x1] }
   0x7   :  { %v1055_v2 = vld [vmem:[%s1911_s3 + $0x30] sm:$0x1]  ;;  %1126 = vset.pattern.permute.xlu1 %v1143_v3  ;;  %1125 = vset.pattern.permute.xlu0 %v1143_v3  ;;  %s32_s26 = sld [smem:[#allocation2]]  ;;  %v173_v6 = vld [vmem:[%s1911_s3 + $0x18] sm:$0x1]  ;;  %v170_v7 = vld [vmem:[%s1911_s3] sm:$0xff] }
   0x8   :  { %202 = vperm.xlu1 %1126, %v1175_v0   ;;  %192 = vperm.xlu0 %1125, %v1180_v1   ;;  %v172_v5 = vld [vmem:[%s1911_s3 + $0x10] sm:$0x1]  ;;  %v171_v8 = vld [vmem:[%s1911_s3 + $0x8] sm:$0xff]  ;;  %v1053_v9 = vld [vmem:[%s1911_s3 + $0x20] sm:$0xff]  ;;  %s950_s13 = sld [smem:[#allocation2 + $0x1]]  ;;  %vm270_vm1 = vcmask 72704  }
   0x9   :  { %1057 = vmatpush.msk.msra.mxu2 %vm319_vm0, %v1055_v2  ;;  %1074 = vmatpush.msk.msra.mxu3 %vm319_vm0, %v1056_v4  ;;  %v1054_v10 = vld [vmem:[%s1911_s3 + $0x28] sm:$0xff]  ;;  %s967_s14 = sld [smem:[#allocation2 + $0x2]]  ;;  %v33_v11 = vld [vmem:[%s1909_s1] sm:$0xff]  ;;  %v1223_v13 = vld [vmem:[%s1910_s2 + $0x18] sm:$0xff]  ;;  %vm457_vm2 = vcmask 556032  }
   0xa   :  { %984 = vmatpush.msk.msra.mxu0 %vm319_vm0, %v172_v5  ;;  %1001 = vmatpush.msk.msra.mxu1 %vm319_vm0, %v173_v6  ;;  %s1018_s17 = sld [smem:[#allocation2 + $0x80]]  ;;  %v1218_v12 = vld [vmem:[%s1910_s2 + $0x20] sm:$0xff]  ;;  %v1228_v14 = vld [vmem:[%s1910_s2 + $0x8] sm:$0xff]  ;;  %v1276_v38 = vld [vmem:[%s1910_s2 + $0x38] sm:$0xff] }
   0xb   :  { %797 = vmatpush.msra.mxu2 %v1053_v9  ;;  %862 = vmatpush.msra.mxu3 %v1054_v10  ;;  %s1019_s18 = sld [smem:[#allocation2 + $0x81]]  ;;  %v951_v16 = vld [vmem:[%s1909_s1 + $0x80] sm:$0xff]  ;;  %v493_v19 = vld [vmem:[%s1909_s1 + $0x8] sm:$0xff]  ;;  %v1281_v39 = vld [vmem:[%s1910_s2 + $0x30] sm:$0xff] }
   0xc   :  { %341 = vmatpush.msra.mxu0 %v170_v7  ;;  %406 = vmatpush.msra.mxu1 %v171_v8  ;;  %s1036_s25 = sld [smem:[#allocation2 + $0x82]]  ;;  %v968_v18 = vld [vmem:[%s1909_s1 + $0x100] sm:$0xff]  ;;  %v1021_v21 = vld [vmem:[%s1909_s1 + $0x88] sm:$0xff]  ;;  %v35_v45 = vld [vmem:[%s1909_s1 + $0x10] sm:$0xff] }
   0xd   :  { %v1230_v15 = vstv %s32_s26  ;;  %1127 = vset.pattern.permute.xlu2 %v1143_v3  ;;  %v1038_v33 = vld [vmem:[%s1909_s1 + $0x108] sm:$0xff]  ;;  %v953_v46 = vld [vmem:[%s1909_s1 + $0x90] sm:$0xff]  ;;  %v1308_v53 = vld [vmem:[%s1910_s2 + $0x40] sm:$0xff] }
   0xe   :  { %v50_v17 = vmul.f32 %v1230_v15, %v33_v11  ;;  %212 = vperm.xlu2 %1127, %v1218_v12   ;;  %v1243_v20 = vstv %s950_s13  ;;  %v51_v26 = vmul.f32 %v493_v19, %v1230_v15  ;;  %v1271_v36 = vld [vmem:[%s1910_s2 + $0x28] sm:$0xff]  ;;  %v52_v50 = vmul.f32 %v1230_v15, %v35_v45  ;;  %v970_v52 = vld [vmem:[%s1909_s1 + $0x110] sm:$0xff]  ;;  %v36_v61 = vld [vmem:[%s1909_s1 + $0x18] sm:$0xff] }
   0xf   :  { %v86_v22 = vmul.f32 %v951_v16, %v1243_v20  ;;  %v1251_v23 = vstv %s967_s14  ;;  %v87_v30 = vmul.f32 %v1021_v21, %v1243_v20  ;;  %v88_v51 = vmul.f32 %v953_v46, %v1243_v20  ;;  %v1313_v55 = vld [vmem:[%s1910_s2 + $0x50] sm:$0xff]  ;;  %v1318_v56 = vld [vmem:[%s1910_s2 + $0x48] sm:$0xff]  ;;  %v954_v62 = vld [vmem:[%s1909_s1 + $0x98] sm:$0xff] }
  0x10   :  { %207 = vperm.xlu1 %1126, %v1223_v13   ;;  %197 = vperm.xlu0 %1125, %v1228_v14   ;;  %v138_v24 = vmul.f32 %v968_v18, %v1251_v23  ;;  %v1254_v25 = vstv %s1018_s17  ;;  %v139_v43 = vmul.f32 %v1038_v33, %v1251_v23  ;;  %v140_v60 = vmul.f32 %v970_v52, %v1251_v23  ;;  %v971_v6 = vld [vmem:[%s1909_s1 + $0x118] sm:$0xff]  ;;  %v1350_v9 = vld [vmem:[%s1910_s2 + $0x68] sm:$0xff]  ;;  %v1355_v10 = vld [vmem:[%s1910_s2 + $0x60] sm:$0xff] }
  0x11   :  { %v102_v27 = vadd.f32 %v86_v22, %v50_v17  ;;  %v509_v28 = vmul.f32 %v1254_v25, %v33_v11  ;;  %v1258_v29 = vstv %s1019_s18  ;;  %v510_v40 = vmul.f32 %v1254_v25, %v493_v19  ;;  %v1345_v7 = vld [vmem:[%s1910_s2 + $0x58] sm:$0xff]  ;;  %v37_v19 = vld [vmem:[%s1909_s1 + $0x20] sm:$0xff] }
  0x12   :  { %v544_v31 = vmul.f32 %v951_v16, %v1258_v29  ;;  %v1262_v32 = vstv %s1036_s25  ;;  %v545_v41 = vmul.f32 %v1021_v21, %v1258_v29  ;;  %v103_v42 = vadd.f32 %v87_v30, %v51_v26  ;;  %v955_v21 = vld [vmem:[%s1909_s1 + $0xa0] sm:$0xff] }
  0x13   :  { %v154_v34 = vadd.f32 %v138_v24, %v102_v27  ;;  %v595_v35 = vmul.f32 %v968_v18, %v1262_v32  ;;  %v596_v48 = vmul.f32 %v1038_v33, %v1262_v32  ;;  %v511_v57 = vmul.f32 %v1254_v25, %v35_v45  ;;  %v972_v30 = vld [vmem:[%s1909_s1 + $0x120] sm:$0xff] }
  0x14   :  { %v560_v37 = vadd.f32 %v544_v31, %v509_v28  ;;  %v561_v47 = vadd.f32 %v545_v41, %v510_v40  ;;  %v155_v49 = vadd.f32 %v139_v43, %v103_v42  ;;  %v546_v58 = vmul.f32 %v953_v46, %v1258_v29  ;;  %v1382_v31 = vld [vmem:[%s1910_s2 + $0x70] sm:$0xff]  ;;  %v38_v42 = vld [vmem:[%s1909_s1 + $0x28] sm:$0xff] }
  0x15   :  { %985 = vmatmul.msk.f32.vlgmr.msra.gmra.mxu0 %vm270_vm1, %v154_v34  ;;  %1002 = vmatmul.msk.f32.vlgmr.msra.gmra.mxu1 %vm270_vm1, %v154_v34  ;;  %v104_v59 = vadd.f32 %v88_v51, %v52_v50  ;;  %v597_v2 = vmul.f32 %v970_v52, %v1262_v32  ;;  %v53_v4 = vmul.f32 %v1230_v15, %v36_v61  ;;  %v1387_v34 = vld [vmem:[%s1910_s2 + $0x78] sm:$0xff]  ;;  %v956_v43 = vld [vmem:[%s1909_s1 + $0xa8] sm:$0xff] }
  0x16   :  { %v611_v44 = vadd.f32 %v595_v35, %v560_v37  ;;  %217 = vperm.xlu2 %1127, %v1271_v36   ;;  %v612_v54 = vadd.f32 %v596_v48, %v561_v47  ;;  %v562_v63 = vadd.f32 %v546_v58, %v511_v57  ;;  %v89_v5 = vmul.f32 %v954_v62, %v1243_v20  ;;  %v39_v57 = vld [vmem:[%s1909_s1 + $0x30] sm:$0xff] }
  0x17   :  { %v156_v3 = vadd.f32 %v140_v60, %v104_v59  ;;  %v512_v11 = vmul.f32 %v1254_v25, %v36_v61  ;;  %v547_v16 = vmul.f32 %v954_v62, %v1258_v29  ;;  %v141_v18 = vmul.f32 %v971_v6, %v1251_v23  ;;  %v957_v58 = vld [vmem:[%s1909_s1 + $0xb0] sm:$0xff] }
  0x18   :  { %227 = vperm.xlu1 %1126, %v1276_v38   ;;  %222 = vperm.xlu0 %1125, %v1281_v39   ;;  %v613_v8 = vadd.f32 %v597_v2, %v562_v63  ;;  %v105_v17 = vadd.f32 %v89_v5, %v53_v4  ;;  %v598_v24 = vmul.f32 %v971_v6, %v1262_v32  ;;  %v40_v5 = vld [vmem:[%s1909_s1 + $0x38] sm:$0xff] }
  0x19   :  { %1058 = vmatmul.msk.f32.vlgmr.msra.gmra.mxu2 %vm270_vm1, %v611_v44  ;;  %1075 = vmatmul.msk.f32.vlgmr.msra.gmra.mxu3 %vm270_vm1, %v611_v44  ;;  %v563_v22 = vadd.f32 %v547_v16, %v512_v11  ;;  %v54_v27 = vmul.f32 %v1230_v15, %v37_v19  ;;  %v90_v28 = vmul.f32 %v955_v21, %v1243_v20  ;;  %v958_v6 = vld [vmem:[%s1909_s1 + $0xb8] sm:$0xff] }
  0x1a   :  { %v157_v26 = vadd.f32 %v141_v18, %v105_v17  ;;  %v513_v35 = vmul.f32 %v1254_v25, %v37_v19  ;;  %v548_v37 = vmul.f32 %v955_v21, %v1258_v29  ;;  %v142_v41 = vmul.f32 %v972_v30, %v1251_v23 }
  0x1b   :  { %v614_v33 = vadd.f32 %v598_v24, %v563_v22  ;;  %v106_v40 = vadd.f32 %v90_v28, %v54_v27  ;;  %v599_v45 = vmul.f32 %v972_v30, %v1262_v32  ;;  %v55_v47 = vmul.f32 %v1230_v15, %v38_v42  ;;  %v41_v24 = vld [vmem:[%s1909_s1 + $0x40] sm:$0xff] }
  0x1c   :  { %v564_v44 = vadd.f32 %v548_v37, %v513_v35  ;;  %v91_v48 = vmul.f32 %v956_v43, %v1243_v20  ;;  %v549_v51 = vmul.f32 %v956_v43, %v1258_v29  ;;  %v56_v62 = vmul.f32 %v1230_v15, %v39_v57  ;;  %v960_v43 = vld [vmem:[%s1909_s1 + $0xc8] sm:$0xff] }
  0x1d   :  { %986 = vmatmul.msk.f32.gmra.mxu0 %vm270_vm1, %v155_v49  ;;  %1003 = vmatmul.msk.f32.gmra.mxu1 %vm270_vm1, %v155_v49  ;;  %v158_v46 = vadd.f32 %v142_v41, %v106_v40  ;;  %v973_v49 = vld [vmem:[%s1909_s1 + $0x128] sm:$0xff]  ;;  %v92_v63 = vmul.f32 %v957_v58, %v1243_v20  ;;  %v57_v17 = vmul.f32 %v1230_v15, %v40_v5 }
  0x1e   :  { %232 = vperm.xlu2 %1127, %v1308_v53   ;;  %v615_v50 = vadd.f32 %v599_v45, %v564_v44  ;;  %v107_v52 = vadd.f32 %v91_v48, %v55_v47  ;;  %v600_v60 = vmul.f32 %v973_v49, %v1262_v32  ;;  %v93_v18 = vmul.f32 %v958_v6, %v1243_v20 }
  0x1f   :  { %v95_v48 = vmul.f32 %v960_v43, %v1243_v20 }
  0x20   :  { %242 = vperm.xlu1 %1126, %v1313_v55   ;;  %237 = vperm.xlu0 %1125, %v1318_v56   ;;  %v109_v21 = vadd.f32 %v93_v18, %v57_v17 }
  0x21   :  { %1059 = vmatmul.msk.f32.gmra.mxu2 %vm270_vm1, %v612_v54  ;;  %1076 = vmatmul.msk.f32.gmra.mxu3 %vm270_vm1, %v612_v54  ;;  %v143_v54 = vmul.f32 %v973_v49, %v1251_v23 }
  0x23   :  { %v159_v61 = vadd.f32 %v143_v54, %v107_v52  ;;  %v961_v52 = vld [vmem:[%s1909_s1 + $0xd0] sm:$0xff] }
  0x25   :  { %987 = vmatmul.msk.f32.gmra.mxu0 %vm270_vm1, %v156_v3  ;;  %1004 = vmatmul.msk.f32.gmra.mxu1 %vm270_vm1, %v156_v3  ;;  %v108_v3 = vadd.f32 %v92_v63, %v56_v62 }
  0x26   :  { %247 = vperm.xlu2 %1127, %v1345_v7  }
  0x28   :  { %257 = vperm.xlu1 %1126, %v1350_v9   ;;  %252 = vperm.xlu0 %1125, %v1355_v10  }
  0x29   :  { %1060 = vmatmul.msk.f32.gmra.mxu2 %vm270_vm1, %v613_v8  ;;  %1077 = vmatmul.msk.f32.gmra.mxu3 %vm270_vm1, %v613_v8 }
  0x2d   :  { %988 = vmatmul.msk.f32.gmra.mxu0 %vm270_vm1, %v157_v26  ;;  %1005 = vmatmul.msk.f32.gmra.mxu1 %vm270_vm1, %v157_v26  ;;  %v959_v26 = vld [vmem:[%s1909_s1 + $0xc0] sm:$0xff] }
  0x2e   :  { %262 = vperm.xlu2 %1127, %v1382_v31   ;;  %v94_v35 = vmul.f32 %v959_v26, %v1243_v20 }
  0x30   :  { %650 = vperm.xlu1 %1126, %v1180_v1   ;;  %267 = vperm.xlu0 %1125, %v1387_v34   ;;  %v514_v1 = vmul.f32 %v1254_v25, %v38_v42  ;;  %v42_v42 = vld [vmem:[%s1909_s1 + $0x48] sm:$0xff] }
  0x31   :  { %1061 = vmatmul.msk.f32.gmra.mxu2 %vm270_vm1, %v614_v33  ;;  %1078 = vmatmul.msk.f32.gmra.mxu3 %vm270_vm1, %v614_v33  ;;  %v58_v33 = vmul.f32 %v1230_v15, %v41_v24  ;;  %v59_v47 = vmul.f32 %v1230_v15, %v42_v42 }
  0x32   :  { %v565_v59 = vadd.f32 %v549_v51, %v514_v1  ;;  %v43_v51 = vld [vmem:[%s1909_s1 + $0x50] sm:$0xff] }
  0x33   :  { %v110_v40 = vadd.f32 %v94_v35, %v58_v33 }
  0x34   :  { %v616_v2 = vadd.f32 %v600_v60, %v565_v59  ;;  %v60_v59 = vmul.f32 %v1230_v15, %v43_v51  ;;  %v96_v60 = vmul.f32 %v961_v52, %v1243_v20 }
  0x35   :  { %989 = vmatmul.msk.f32.gmra.mxu0 %vm270_vm1, %v158_v46  ;;  %1006 = vmatmul.msk.f32.gmra.mxu1 %vm270_vm1, %v158_v46 }
  0x36   :  { %655 = vperm.xlu2 %1127, %v1228_v14   ;;  %v974_v14 = vld [vmem:[%s1909_s1 + $0x130] sm:$0xff]  ;;  %v112_v62 = vadd.f32 %v96_v60, %v60_v59 }
  0x37   :  { %v144_v4 = vmul.f32 %v974_v14, %v1251_v23  ;;  %v601_v11 = vmul.f32 %v974_v14, %v1262_v32  ;;  %v44_v14 = vld [vmem:[%s1909_s1 + $0x58] sm:$0xff]  ;;  %v982_v59 = vld [vmem:[%s1909_s1 + $0x170] sm:$0xff] }
  0x38   :  { %665 = vperm.xlu1 %1126, %v1223_v13   ;;  %660 = vperm.xlu0 %1125, %v1175_v0   ;;  %v515_v13 = vmul.f32 %v1254_v25, %v39_v57  ;;  %v550_v0 = vmul.f32 %v957_v58, %v1258_v29 }
  0x39   :  { %1062 = vmatmul.msk.f32.gmra.mxu2 %vm270_vm1, %v615_v50  ;;  %1079 = vmatmul.msk.f32.gmra.mxu3 %vm270_vm1, %v615_v50  ;;  %v160_v16 = vadd.f32 %v144_v4, %v108_v3  ;;  %v111_v50 = vadd.f32 %v95_v48, %v59_v47  ;;  %v61_v4 = vmul.f32 %v1230_v15, %v44_v14 }
  0x3a   :  { %v566_v8 = vadd.f32 %v550_v0, %v515_v13 }
  0x3c   :  { %v617_v19 = vadd.f32 %v601_v11, %v566_v8  ;;  %v520_v11 = vmul.f32 %v1254_v25, %v44_v14 }
  0x3d   :  { %990 = vmatmul.msk.f32.gmra.mxu0 %vm270_vm1, %v159_v61  ;;  %1007 = vmatmul.msk.f32.gmra.mxu1 %vm270_vm1, %v159_v61 }
  0x3e   :  { %670 = vperm.xlu2 %1127, %v1218_v12   ;;  %v975_v12 = vld [vmem:[%s1909_s1 + $0x138] sm:$0xff] }
  0x3f   :  { %v145_v22 = vmul.f32 %v975_v12, %v1251_v23  ;;  %v602_v28 = vmul.f32 %v975_v12, %v1262_v32  ;;  %v45_v12 = vld [vmem:[%s1909_s1 + $0x60] sm:$0xff] }
  0x40   :  { %680 = vperm.xlu1 %1126, %v1281_v39   ;;  %675 = vperm.xlu0 %1125, %v1271_v36   ;;  %v516_v39 = vmul.f32 %v1254_v25, %v40_v5  ;;  %v551_v36 = vmul.f32 %v958_v6, %v1258_v29  ;;  %v979_v6 = vld [vmem:[%s1909_s1 + $0x158] sm:$0xff] }
  0x41   :  { %1063 = vmatmul.msk.f32.gmra.mxu2 %vm270_vm1, %v616_v2  ;;  %1080 = vmatmul.msk.f32.gmra.mxu3 %vm270_vm1, %v616_v2  ;;  %v161_v30 = vadd.f32 %v145_v22, %v109_v21  ;;  %v962_v2 = vld [vmem:[%s1909_s1 + $0xd8] sm:$0xff]  ;;  %v149_v18 = vmul.f32 %v979_v6, %v1251_v23  ;;  %v62_v22 = vmul.f32 %v1230_v15, %v45_v12 }
  0x42   :  { %v567_v27 = vadd.f32 %v551_v36, %v516_v39  ;;  %v97_v5 = vmul.f32 %v962_v2, %v1243_v20  ;;  %v606_v36 = vmul.f32 %v979_v6, %v1262_v32 }
  0x44   :  { %v618_v37 = vadd.f32 %v602_v28, %v567_v27  ;;  %v113_v17 = vadd.f32 %v97_v5, %v61_v4  ;;  %v521_v28 = vmul.f32 %v1254_v25, %v45_v12 }
  0x45   :  { %991 = vmatmul.msk.f32.gmra.mxu0 %vm270_vm1, %v160_v16  ;;  %1008 = vmatmul.msk.f32.gmra.mxu1 %vm270_vm1, %v160_v16  ;;  %v555_v16 = vmul.f32 %v962_v2, %v1258_v29  ;;  %v609_v2 = vmul.f32 %v982_v59, %v1262_v32 }
  0x46   :  { %685 = vperm.xlu2 %1127, %v1276_v38   ;;  %v976_v38 = vld [vmem:[%s1909_s1 + $0x140] sm:$0xff]  ;;  %v165_v21 = vadd.f32 %v149_v18, %v113_v17 }
  0x47   :  { %v146_v41 = vmul.f32 %v976_v38, %v1251_v23  ;;  %v603_v45 = vmul.f32 %v976_v38, %v1262_v32  ;;  %v571_v39 = vadd.f32 %v555_v16, %v520_v11 }
  0x48   :  { %695 = vperm.xlu1 %1126, %v1318_v56   ;;  %690 = vperm.xlu0 %1125, %v1308_v53   ;;  %v517_v56 = vmul.f32 %v1254_v25, %v41_v24  ;;  %v552_v53 = vmul.f32 %v959_v26, %v1258_v29  ;;  %v980_v26 = vld [vmem:[%s1909_s1 + $0x160] sm:$0xff] }
  0x49   :  { %1064 = vmatmul.msk.f32.gmra.mxu2 %vm270_vm1, %v617_v19  ;;  %1081 = vmatmul.msk.f32.gmra.mxu3 %vm270_vm1, %v617_v19  ;;  %v162_v46 = vadd.f32 %v146_v41, %v110_v40  ;;  %v963_v19 = vld [vmem:[%s1909_s1 + $0xe0] sm:$0xff]  ;;  %v622_v27 = vadd.f32 %v606_v36, %v571_v39  ;;  %v150_v35 = vmul.f32 %v980_v26, %v1251_v23 }
  0x4a   :  { %v568_v44 = vadd.f32 %v552_v53, %v517_v56  ;;  %v98_v24 = vmul.f32 %v963_v19, %v1243_v20  ;;  %v964_v56 = vld [vmem:[%s1909_s1 + $0xe8] sm:$0xff]  ;;  %v607_v40 = vmul.f32 %v980_v26, %v1262_v32 }
  0x4b   :  { %v557_v47 = vmul.f32 %v964_v56, %v1258_v29 }
  0x4c   :  { %v619_v49 = vadd.f32 %v603_v45, %v568_v44  ;;  %v114_v33 = vadd.f32 %v98_v24, %v62_v22  ;;  %v981_v44 = vld [vmem:[%s1909_s1 + $0x168] sm:$0xff] }
  0x4d   :  { %992 = vmatmul.msk.f32.gmra.mxu0 %vm270_vm1, %v161_v30  ;;  %1009 = vmatmul.msk.f32.gmra.mxu1 %vm270_vm1, %v161_v30  ;;  %v556_v30 = vmul.f32 %v963_v19, %v1258_v29 }
  0x4e   :  { %700 = vperm.xlu2 %1127, %v1313_v55   ;;  %v977_v55 = vld [vmem:[%s1909_s1 + $0x148] sm:$0xff]  ;;  %v166_v41 = vadd.f32 %v150_v35, %v114_v33 }
  0x4f   :  { %v147_v1 = vmul.f32 %v977_v55, %v1251_v23  ;;  %v604_v57 = vmul.f32 %v977_v55, %v1262_v32  ;;  %v572_v53 = vadd.f32 %v556_v30, %v521_v28  ;;  %v151_v55 = vmul.f32 %v981_v44, %v1251_v23 }
  0x50   :  { %710 = vperm.xlu1 %1126, %v1355_v10   ;;  %705 = vperm.xlu0 %1125, %v1345_v7   ;;  %v518_v10 = vmul.f32 %v1254_v25, %v42_v42  ;;  %v553_v7 = vmul.f32 %v960_v43, %v1258_v29  ;;  %v99_v43 = vmul.f32 %v964_v56, %v1243_v20 }
  0x51   :  { %1065 = vmatmul.msk.f32.gmra.mxu2 %vm270_vm1, %v618_v37  ;;  %1082 = vmatmul.msk.f32.gmra.mxu3 %vm270_vm1, %v618_v37  ;;  %v163_v58 = vadd.f32 %v147_v1, %v111_v50  ;;  %v46_v37 = vld [vmem:[%s1909_s1 + $0x68] sm:$0xff]  ;;  %v623_v45 = vadd.f32 %v607_v40, %v572_v53  ;;  %v608_v50 = vmul.f32 %v981_v44, %v1262_v32 }
  0x52   :  { %v569_v54 = vadd.f32 %v553_v7, %v518_v10  ;;  %v63_v42 = vmul.f32 %v1230_v15, %v46_v37  ;;  %v965_v10 = vld [vmem:[%s1909_s1 + $0xf0] sm:$0xff] }
  0x54   :  { %v620_v61 = vadd.f32 %v604_v57, %v569_v54  ;;  %v115_v48 = vadd.f32 %v99_v43, %v63_v42 }
  0x55   :  { %993 = vmatmul.msk.f32.gmra.mxu0 %vm270_vm1, %v162_v46  ;;  %1010 = vmatmul.msk.f32.gmra.mxu1 %vm270_vm1, %v162_v46  ;;  %v522_v46 = vmul.f32 %v1254_v25, %v46_v37 }
  0x56   :  { %715 = vperm.xlu2 %1127, %v1350_v9   ;;  %v978_v9 = vld [vmem:[%s1909_s1 + $0x150] sm:$0xff]  ;;  %v167_v54 = vadd.f32 %v151_v55, %v115_v48 }
  0x57   :  { %v148_v63 = vmul.f32 %v978_v9, %v1251_v23  ;;  %v605_v0 = vmul.f32 %v978_v9, %v1262_v32  ;;  %v573_v7 = vadd.f32 %v557_v47, %v522_v46 }
  0x58   :  { %725 = vperm.xlu1 %1126, %v1387_v34   ;;  %720 = vperm.xlu0 %1125, %v1382_v31   ;;  %v519_v34 = vmul.f32 %v1254_v25, %v43_v51  ;;  %v554_v31 = vmul.f32 %v961_v52, %v1258_v29 }
  0x59   :  { %1066 = vmatmul.msk.f32.gmra.mxu2 %vm270_vm1, %v619_v49  ;;  %1083 = vmatmul.msk.f32.gmra.mxu3 %vm270_vm1, %v619_v49  ;;  %v164_v3 = vadd.f32 %v148_v63, %v112_v62  ;;  %v47_v49 = vld [vmem:[%s1909_s1 + $0x70] sm:$0xff]  ;;  %v624_v60 = vadd.f32 %v608_v50, %v573_v7  ;;  %v48_v62 = vld [vmem:[%s1909_s1 + $0x78] sm:$0xff] }
  0x5a   :  { %v570_v13 = vadd.f32 %v554_v31, %v519_v34  ;;  %v64_v57 = vmul.f32 %v1230_v15, %v47_v49  ;;  %v523_v9 = vmul.f32 %v1254_v25, %v47_v49  ;;  %v152_v31 = vmul.f32 %v982_v59, %v1251_v23  ;;  %v966_v63 = vld [vmem:[%s1909_s1 + $0xf8] sm:$0xff] }
  0x5b   :  { %v65_v4 = vmul.f32 %v1230_v15, %v48_v62  ;;  %v101_v5 = vmul.f32 %v966_v63, %v1243_v20  ;;  %v524_v16 = vmul.f32 %v1254_v25, %v48_v62  ;;  %v559_v17 = vmul.f32 %v966_v63, %v1258_v29 }
  0x5c   :  { %v621_v8 = vadd.f32 %v605_v0, %v570_v13 }
  0x5d   :  { %994 = vmatmul.msk.f32.gmra.mxu0 %vm270_vm1, %v163_v58  ;;  %1011 = vmatmul.msk.f32.gmra.mxu1 %vm270_vm1, %v163_v58  ;;  %v100_v58 = vmul.f32 %v965_v10, %v1243_v20  ;;  %v117_v18 = vadd.f32 %v101_v5, %v65_v4  ;;  %v575_v20 = vadd.f32 %v559_v17, %v524_v16 }
  0x5f   :  { %v116_v34 = vadd.f32 %v100_v58, %v64_v57 }
  0x61   :  { %1067 = vmatmul.msk.f32.gmra.mxu2 %vm270_vm1, %v620_v61  ;;  %1084 = vmatmul.msk.f32.gmra.mxu3 %vm270_vm1, %v620_v61  ;;  %v558_v61 = vmul.f32 %v965_v10, %v1258_v29 }
  0x63   :  { %v574_v14 = vadd.f32 %v558_v61, %v523_v9 }
  0x65   :  { %995 = vmatmul.msk.f32.gmra.mxu0 %vm270_vm1, %v164_v3  ;;  %1012 = vmatmul.msk.f32.gmra.mxu1 %vm270_vm1, %v164_v3  ;;  %v168_v3 = vadd.f32 %v152_v31, %v116_v34  ;;  %v625_v11 = vadd.f32 %v609_v2, %v574_v14 }
  0x68   :  { %v1564_v38 = vpop.permute.xlu2 %212 }
  0x69   :  { %1068 = vmatmul.msk.f32.gmra.mxu2 %vm270_vm1, %v621_v8  ;;  %1085 = vmatmul.msk.f32.gmra.mxu3 %vm270_vm1, %v621_v8  ;;  %v983_v8 = vld [vmem:[%s1909_s1 + $0x178] sm:$0xff] }
  0x6a   :  { %v153_v15 = vmul.f32 %v983_v8, %v1251_v23  ;;  %v610_v12 = vmul.f32 %v983_v8, %v1262_v32 }
  0x6c   :  { %v169_v25 = vadd.f32 %v153_v15, %v117_v18  ;;  %v626_v29 = vadd.f32 %v610_v12, %v575_v20 }
  0x6d   :  { %996 = vmatmul.msk.f32.gmra.mxu0 %vm270_vm1, %v165_v21  ;;  %1013 = vmatmul.msk.f32.gmra.mxu1 %vm270_vm1, %v165_v21 }
  0x70   :  { %v1594_v1 = vpop.permute.xlu2 %217 }
  0x71   :  { %1069 = vmatmul.msk.f32.gmra.mxu2 %vm270_vm1, %v622_v27  ;;  %1086 = vmatmul.msk.f32.gmra.mxu3 %vm270_vm1, %v622_v27 }
  0x75   :  { %997 = vmatmul.msk.f32.gmra.mxu0 %vm270_vm1, %v166_v41  ;;  %1014 = vmatmul.msk.f32.gmra.mxu1 %vm270_vm1, %v166_v41 }
  0x78   :  { %v1621_v6 = vpop.permute.xlu2 %232 }
  0x79   :  { %1070 = vmatmul.msk.f32.gmra.mxu2 %vm270_vm1, %v623_v45  ;;  %1087 = vmatmul.msk.f32.gmra.mxu3 %vm270_vm1, %v623_v45 }
  0x7a   :  { %v1596_v51 = vpop.permute.xlu1 %202  ;;  %v193_v52 = vpop.permute.xlu0 %192 }
  0x7d   :  { %998 = vmatmul.msk.f32.gmra.mxu0 %vm270_vm1, %v167_v54  ;;  %1015 = vmatmul.msk.f32.gmra.mxu1 %vm270_vm1, %v167_v54 }
  0x80   :  { %v1638_v36 = vpop.permute.xlu2 %247 }
  0x81   :  { %1071 = vmatmul.msk.f32.gmra.mxu2 %vm270_vm1, %v624_v60  ;;  %1088 = vmatmul.msk.f32.gmra.mxu3 %vm270_vm1, %v624_v60 }
  0x82   :  { %v1617_v13 = vpop.permute.xlu1 %207  ;;  %v198_v0 = vpop.permute.xlu0 %197 }
  0x85   :  { %999 = vmatmul.msk.f32.gmra.mxu0 %vm270_vm1, %v168_v3  ;;  %1016 = vmatmul.msk.f32.gmra.mxu1 %vm270_vm1, %v168_v3 }
  0x88   :  { %v1655_v27 = vpop.permute.xlu2 %262 }
  0x89   :  { %1072 = vmatmul.msk.f32.gmra.mxu2 %vm270_vm1, %v625_v11  ;;  %1089 = vmatmul.msk.f32.gmra.mxu3 %vm270_vm1, %v625_v11 }
  0x8a   :  { %v1634_v19 = vpop.permute.xlu1 %227  ;;  %v1636_v39 = vpop.permute.xlu0 %222 }
  0x8d   :  { %1000 = vmatmul.msk.f32.gmra.mxu0 %vm270_vm1, %v169_v25  ;;  %1017 = vmatmul.msk.f32.gmra.mxu1 %vm270_vm1, %v169_v25 }
  0x90   :  { %v656_v41 = vpop.permute.xlu2 %655 }
  0x91   :  { %1073 = vmatmul.msk.f32.gmra.mxu2 %vm270_vm1, %v626_v29  ;;  %1090 = vmatmul.msk.f32.gmra.mxu3 %vm270_vm1, %v626_v29 }
  0x92   :  { %v1644_v23 = vpop.permute.xlu1 %242  ;;  %v1646_v21 = vpop.permute.xlu0 %237 }
  0x93   :  { %v343_v32 = vpop.f32.mrf.mxu0  ;;  %v408_v22 = vpop.f32.mrf.mxu1 }
  0x94   :  { %v344_v24 = vadd.f32 %v343_v32, %v193_v52  ;;  %v409_v26 = vadd.f32 %v408_v22, %v193_v52 }
  0x96   :  { %456 = vst [vmem:[%s1912_s4] sm:$0xff] %v344_v24 }
  0x97   :  { %458 = vst.msk [vmem:[%s1912_s4 + $0x8] sm:$0xff] %vm457_vm2, %v409_v26 }
  0x98   :  { %v671_v4 = vpop.permute.xlu2 %670 }
  0x9a   :  { %v1657_v28 = vpop.permute.xlu1 %257  ;;  %v1659_v30 = vpop.permute.xlu0 %252 }
  0x9b   :  { %v346_v33 = vpop.f32.mrf.mxu0  ;;  %v411_v35 = vpop.f32.mrf.mxu1 }
  0x9c   :  { %v799_v37 = vpop.f32.mrf.mxu2  ;;  %v864_v56 = vpop.f32.mrf.mxu3  ;;  %v347_v53 = vadd.f32 %v346_v33, %v198_v0  ;;  %v412_v40 = vadd.f32 %v411_v35, %v198_v0 }
  0x9e   :  { %459 = vst [vmem:[%s1912_s4 + $0x10] sm:$0xff] %v347_v53 }
  0x9f   :  { %460 = vst.msk [vmem:[%s1912_s4 + $0x18] sm:$0xff] %vm457_vm2, %v412_v40 }
  0xa2   :  { %v651_v42 = vpop.permute.xlu1 %650  ;;  %v1668_v43 = vpop.permute.xlu0 %267 }
  0xa3   :  { %v349_v44 = vpop.f32.mrf.mxu0  ;;  %v414_v45 = vpop.f32.mrf.mxu1  ;;  %v800_v46 = vadd.f32 %v799_v37, %v651_v42  ;;  %v865_v50 = vadd.f32 %v864_v56, %v651_v42 }
  0xa4   :  { %v802_v47 = vpop.f32.mrf.mxu2  ;;  %v867_v48 = vpop.f32.mrf.mxu3  ;;  %v350_v55 = vadd.f32 %v349_v44, %v1596_v51  ;;  %v415_v7 = vadd.f32 %v414_v45, %v1596_v51 }
  0xa5   :  { %v803_v49 = vadd.f32 %v802_v47, %v656_v41  ;;  %v868_v10 = vadd.f32 %v867_v48, %v656_v41  ;;  %1091 = vst [vmem:[%s1912_s4 + $0x100] sm:$0xff] %v800_v46  ;;  %v686_v44 = vpop.permute.xlu2 %685 }
  0xa6   :  { %461 = vst [vmem:[%s1912_s4 + $0x20] sm:$0xff] %v350_v55 }
  0xa7   :  { %1093 = vst [vmem:[%s1912_s4 + $0x110] sm:$0xff] %v803_v49 }
  0xa8   :  { %1094 = vst.msk [vmem:[%s1912_s4 + $0x118] sm:$0xff] %vm457_vm2, %v868_v10 }
  0xa9   :  { %462 = vst.msk [vmem:[%s1912_s4 + $0x28] sm:$0xff] %vm457_vm2, %v415_v7 }
  0xaa   :  { %1092 = vst.msk [vmem:[%s1912_s4 + $0x108] sm:$0xff] %vm457_vm2, %v865_v50  ;;  %v661_v51 = vpop.permute.xlu0 %660  ;;  %v666_v34 = vpop.permute.xlu1 %665 }
  0xab   :  { %v352_v52 = vpop.f32.mrf.mxu0  ;;  %v417_v54 = vpop.f32.mrf.mxu1 }
  0xac   :  { %v805_v57 = vpop.f32.mrf.mxu2  ;;  %v870_v58 = vpop.f32.mrf.mxu3  ;;  %v353_v59 = vadd.f32 %v352_v52, %v1617_v13  ;;  %v418_v60 = vadd.f32 %v417_v54, %v1617_v13 }
  0xad   :  { %v806_v9 = vadd.f32 %v805_v57, %v661_v51  ;;  %v871_v61 = vadd.f32 %v870_v58, %v661_v51 }
  0xae   :  { %463 = vst [vmem:[%s1912_s4 + $0x30] sm:$0xff] %v353_v59 }
  0xaf   :  { %464 = vst.msk [vmem:[%s1912_s4 + $0x38] sm:$0xff] %vm457_vm2, %v418_v60 }
  0xb0   :  { %1095 = vst [vmem:[%s1912_s4 + $0x120] sm:$0xff] %v806_v9 }
  0xb1   :  { %1096 = vst.msk [vmem:[%s1912_s4 + $0x128] sm:$0xff] %vm457_vm2, %v871_v61 }
  0xb2   :  { %v676_v20 = vpop.permute.xlu0 %675  ;;  %v681_v33 = vpop.permute.xlu1 %680 }
  0xb3   :  { %v355_v31 = vpop.f32.mrf.mxu0  ;;  %v420_v62 = vpop.f32.mrf.mxu1 }
  0xb4   :  { %v808_v63 = vpop.f32.mrf.mxu2  ;;  %v873_v14 = vpop.f32.mrf.mxu3  ;;  %v356_v2 = vadd.f32 %v355_v31, %v1564_v38  ;;  %v421_v3 = vadd.f32 %v420_v62, %v1564_v38 }
  0xb5   :  { %v809_v13 = vadd.f32 %v808_v63, %v666_v34  ;;  %v874_v0 = vadd.f32 %v873_v14, %v666_v34 }
  0xb6   :  { %465 = vst [vmem:[%s1912_s4 + $0x40] sm:$0xff] %v356_v2  ;;  %v701_v2 = vpop.permute.xlu2 %700 }
  0xb7   :  { %1097 = vst [vmem:[%s1912_s4 + $0x130] sm:$0xff] %v809_v13 }
  0xb8   :  { %1098 = vst.msk [vmem:[%s1912_s4 + $0x138] sm:$0xff] %vm457_vm2, %v874_v0 }
  0xb9   :  { %466 = vst.msk [vmem:[%s1912_s4 + $0x48] sm:$0xff] %vm457_vm2, %v421_v3 }
  0xba   :  { %v691_v7 = vpop.permute.xlu0 %690  ;;  %v696_v60 = vpop.permute.xlu1 %695 }
  0xbb   :  { %v358_v38 = vpop.f32.mrf.mxu0  ;;  %v423_v5 = vpop.f32.mrf.mxu1 }
  0xbc   :  { %v811_v8 = vpop.f32.mrf.mxu2  ;;  %v876_v11 = vpop.f32.mrf.mxu3  ;;  %v359_v16 = vadd.f32 %v358_v38, %v1594_v1  ;;  %v424_v15 = vadd.f32 %v423_v5, %v1594_v1 }
  0xbd   :  { %v812_v17 = vadd.f32 %v811_v8, %v671_v4  ;;  %v877_v18 = vadd.f32 %v876_v11, %v671_v4 }
  0xbe   :  { %467 = vst [vmem:[%s1912_s4 + $0x50] sm:$0xff] %v359_v16 }
  0xbf   :  { %1099 = vst [vmem:[%s1912_s4 + $0x140] sm:$0xff] %v812_v17 }
  0xc0   :  { %1100 = vst.msk [vmem:[%s1912_s4 + $0x148] sm:$0xff] %vm457_vm2, %v877_v18 }
  0xc1   :  { %468 = vst.msk [vmem:[%s1912_s4 + $0x58] sm:$0xff] %vm457_vm2, %v424_v15 }
  0xc2   :  { %v706_v11 = vpop.permute.xlu0 %705 }
  0xc3   :  { %v361_v1 = vpop.f32.mrf.mxu0  ;;  %v426_v12 = vpop.f32.mrf.mxu1 }
  0xc4   :  { %v814_v25 = vpop.f32.mrf.mxu2  ;;  %v879_v29 = vpop.f32.mrf.mxu3  ;;  %v362_v32 = vadd.f32 %v361_v1, %v1636_v39  ;;  %v427_v26 = vadd.f32 %v426_v12, %v1636_v39 }
  0xc5   :  { %v815_v22 = vadd.f32 %v814_v25, %v676_v20  ;;  %v880_v24 = vadd.f32 %v879_v29, %v676_v20  ;;  %v711_v25 = vpop.permute.xlu1 %710 }
  0xc6   :  { %469 = vst [vmem:[%s1912_s4 + $0x60] sm:$0xff] %v362_v32 }
  0xc7   :  { %1101 = vst [vmem:[%s1912_s4 + $0x150] sm:$0xff] %v815_v22 }
  0xc8   :  { %1102 = vst.msk [vmem:[%s1912_s4 + $0x158] sm:$0xff] %vm457_vm2, %v880_v24 }
  0xc9   :  { %470 = vst.msk [vmem:[%s1912_s4 + $0x68] sm:$0xff] %vm457_vm2, %v427_v26 }
  0xcb   :  { %v364_v39 = vpop.f32.mrf.mxu0  ;;  %v429_v35 = vpop.f32.mrf.mxu1 }
  0xcc   :  { %v817_v37 = vpop.f32.mrf.mxu2  ;;  %v882_v56 = vpop.f32.mrf.mxu3  ;;  %v365_v53 = vadd.f32 %v364_v39, %v1634_v19  ;;  %v430_v42 = vadd.f32 %v429_v35, %v1634_v19 }
  0xcd   :  { %v818_v40 = vadd.f32 %v817_v37, %v681_v33  ;;  %v883_v41 = vadd.f32 %v882_v56, %v681_v33  ;;  %v716_v35 = vpop.permute.xlu2 %715 }
  0xce   :  { %471 = vst [vmem:[%s1912_s4 + $0x70] sm:$0xff] %v365_v53 }
  0xcf   :  { %1103 = vst [vmem:[%s1912_s4 + $0x160] sm:$0xff] %v818_v40 }
  0xd0   :  { %1104 = vst.msk [vmem:[%s1912_s4 + $0x168] sm:$0xff] %vm457_vm2, %v883_v41 }
  0xd1   :  { %472 = vst.msk [vmem:[%s1912_s4 + $0x78] sm:$0xff] %vm457_vm2, %v430_v42 }
  0xd3   :  { %v367_v19 = vpop.f32.mrf.mxu0  ;;  %v432_v45 = vpop.f32.mrf.mxu1 }
  0xd4   :  { %v820_v46 = vpop.f32.mrf.mxu2  ;;  %v885_v47 = vpop.f32.mrf.mxu3  ;;  %v368_v48 = vadd.f32 %v367_v19, %v1621_v6  ;;  %v433_v10 = vadd.f32 %v432_v45, %v1621_v6 }
  0xd5   :  { %v821_v55 = vadd.f32 %v820_v46, %v686_v44  ;;  %v886_v49 = vadd.f32 %v885_v47, %v686_v44  ;;  %v721_v19 = vpop.permute.xlu0 %720 }
  0xd6   :  { %473 = vst [vmem:[%s1912_s4 + $0x80] sm:$0xff] %v368_v48 }
  0xd7   :  { %1105 = vst [vmem:[%s1912_s4 + $0x170] sm:$0xff] %v821_v55 }
  0xd8   :  { %1106 = vst.msk [vmem:[%s1912_s4 + $0x178] sm:$0xff] %vm457_vm2, %v886_v49 }
  0xd9   :  { %474 = vst.msk [vmem:[%s1912_s4 + $0x88] sm:$0xff] %vm457_vm2, %v433_v10 }
  0xdb   :  { %v370_v6 = vpop.f32.mrf.mxu0  ;;  %v435_v50 = vpop.f32.mrf.mxu1 }
  0xdc   :  { %v823_v51 = vpop.f32.mrf.mxu2  ;;  %v888_v52 = vpop.f32.mrf.mxu3  ;;  %v371_v54 = vadd.f32 %v370_v6, %v1646_v21  ;;  %v436_v59 = vadd.f32 %v435_v50, %v1646_v21 }
  0xdd   :  { %v824_v57 = vadd.f32 %v823_v51, %v691_v7  ;;  %v889_v58 = vadd.f32 %v888_v52, %v691_v7  ;;  %v726_v7 = vpop.permute.xlu1 %725 }
  0xde   :  { %475 = vst [vmem:[%s1912_s4 + $0x90] sm:$0xff] %v371_v54 }
  0xdf   :  { %1107 = vst [vmem:[%s1912_s4 + $0x180] sm:$0xff] %v824_v57 }
  0xe0   :  { %1108 = vst.msk [vmem:[%s1912_s4 + $0x188] sm:$0xff] %vm457_vm2, %v889_v58 }
  0xe1   :  { %476 = vst.msk [vmem:[%s1912_s4 + $0x98] sm:$0xff] %vm457_vm2, %v436_v59 }
  0xe3   :  { %v373_v21 = vpop.f32.mrf.mxu0  ;;  %v438_v9 = vpop.f32.mrf.mxu1 }
  0xe4   :  { %v826_v61 = vpop.f32.mrf.mxu2  ;;  %v891_v34 = vpop.f32.mrf.mxu3  ;;  %v374_v31 = vadd.f32 %v373_v21, %v1644_v23  ;;  %v439_v14 = vadd.f32 %v438_v9, %v1644_v23 }
  0xe5   :  { %v827_v62 = vadd.f32 %v826_v61, %v696_v60  ;;  %v892_v63 = vadd.f32 %v891_v34, %v696_v60 }
  0xe6   :  { %477 = vst [vmem:[%s1912_s4 + $0xa0] sm:$0xff] %v374_v31 }
  0xe7   :  { %1109 = vst [vmem:[%s1912_s4 + $0x190] sm:$0xff] %v827_v62 }
  0xe8   :  { %1110 = vst.msk [vmem:[%s1912_s4 + $0x198] sm:$0xff] %vm457_vm2, %v892_v63 }
  0xe9   :  { %478 = vst.msk [vmem:[%s1912_s4 + $0xa8] sm:$0xff] %vm457_vm2, %v439_v14 }
  0xeb   :  { %v376_v23 = vpop.f32.mrf.mxu0  ;;  %v441_v13 = vpop.f32.mrf.mxu1 }
  0xec   :  { %v829_v0 = vpop.f32.mrf.mxu2  ;;  %v894_v3 = vpop.f32.mrf.mxu3  ;;  %v377_v4 = vadd.f32 %v376_v23, %v1638_v36  ;;  %v442_v8 = vadd.f32 %v441_v13, %v1638_v36 }
  0xed   :  { %v830_v38 = vadd.f32 %v829_v0, %v701_v2  ;;  %v895_v5 = vadd.f32 %v894_v3, %v701_v2 }
  0xee   :  { %479 = vst [vmem:[%s1912_s4 + $0xb0] sm:$0xff] %v377_v4 }
  0xef   :  { %1111 = vst [vmem:[%s1912_s4 + $0x1a0] sm:$0xff] %v830_v38 }
  0xf0   :  { %1112 = vst.msk [vmem:[%s1912_s4 + $0x1a8] sm:$0xff] %vm457_vm2, %v895_v5 }
  0xf1   :  { %480 = vst.msk [vmem:[%s1912_s4 + $0xb8] sm:$0xff] %vm457_vm2, %v442_v8 }
  0xf3   :  { %v379_v36 = vpop.f32.mrf.mxu0  ;;  %v444_v16 = vpop.f32.mrf.mxu1 }
  0xf4   :  { %v832_v17 = vpop.f32.mrf.mxu2  ;;  %v897_v18 = vpop.f32.mrf.mxu3  ;;  %v380_v15 = vadd.f32 %v379_v36, %v1659_v30  ;;  %v445_v12 = vadd.f32 %v444_v16, %v1659_v30 }
  0xf5   :  { %v833_v20 = vadd.f32 %v832_v17, %v706_v11  ;;  %v898_v1 = vadd.f32 %v897_v18, %v706_v11 }
  0xf6   :  { %481 = vst [vmem:[%s1912_s4 + $0xc0] sm:$0xff] %v380_v15 }
  0xf7   :  { %1113 = vst [vmem:[%s1912_s4 + $0x1b0] sm:$0xff] %v833_v20 }
  0xf8   :  { %1114 = vst.msk [vmem:[%s1912_s4 + $0x1b8] sm:$0xff] %vm457_vm2, %v898_v1 }
  0xf9   :  { %482 = vst.msk [vmem:[%s1912_s4 + $0xc8] sm:$0xff] %vm457_vm2, %v445_v12 }
  0xfb   :  { %v382_v30 = vpop.f32.mrf.mxu0  ;;  %v447_v29 = vpop.f32.mrf.mxu1 }
  0xfc   :  { %v835_v32 = vpop.f32.mrf.mxu2  ;;  %v900_v22 = vpop.f32.mrf.mxu3  ;;  %v383_v24 = vadd.f32 %v382_v30, %v1657_v28  ;;  %v448_v39 = vadd.f32 %v447_v29, %v1657_v28 }
  0xfd   :  { %v836_v26 = vadd.f32 %v835_v32, %v711_v25  ;;  %v901_v33 = vadd.f32 %v900_v22, %v711_v25 }
  0xfe   :  { %483 = vst [vmem:[%s1912_s4 + $0xd0] sm:$0xff] %v383_v24 }
  0xff   :  { %1115 = vst [vmem:[%s1912_s4 + $0x1c0] sm:$0xff] %v836_v26 }
 0x100   :  { %1116 = vst.msk [vmem:[%s1912_s4 + $0x1c8] sm:$0xff] %vm457_vm2, %v901_v33 }
 0x101   :  { %484 = vst.msk [vmem:[%s1912_s4 + $0xd8] sm:$0xff] %vm457_vm2, %v448_v39 }
 0x103   :  { %v385_v28 = vpop.f32.mrf.mxu0  ;;  %v450_v37 = vpop.f32.mrf.mxu1 }
 0x104   :  { %v838_v56 = vpop.f32.mrf.mxu2  ;;  %v903_v53 = vpop.f32.mrf.mxu3  ;;  %v386_v40 = vadd.f32 %v385_v28, %v1655_v27  ;;  %v451_v44 = vadd.f32 %v450_v37, %v1655_v27 }
 0x105   :  { %v839_v41 = vadd.f32 %v838_v56, %v716_v35  ;;  %v904_v42 = vadd.f32 %v903_v53, %v716_v35 }
 0x106   :  { %485 = vst [vmem:[%s1912_s4 + $0xe0] sm:$0xff] %v386_v40 }
 0x107   :  { %1117 = vst [vmem:[%s1912_s4 + $0x1d0] sm:$0xff] %v839_v41 }
 0x108   :  { %1118 = vst.msk [vmem:[%s1912_s4 + $0x1d8] sm:$0xff] %vm457_vm2, %v904_v42 }
 0x109   :  { %486 = vst.msk [vmem:[%s1912_s4 + $0xe8] sm:$0xff] %vm457_vm2, %v451_v44 }
 0x10b   :  { %v388_v27 = vpop.f32.mrf.mxu0  ;;  %v453_v45 = vpop.f32.mrf.mxu1 }
 0x10c   :  { %v841_v46 = vpop.f32.mrf.mxu2  ;;  %v906_v47 = vpop.f32.mrf.mxu3  ;;  %v389_v48 = vadd.f32 %v388_v27, %v1668_v43  ;;  %v454_v10 = vadd.f32 %v453_v45, %v1668_v43 }
 0x10d   :  { %v842_v55 = vadd.f32 %v841_v46, %v721_v19  ;;  %v907_v49 = vadd.f32 %v906_v47, %v721_v19 }
 0x10e   :  { %487 = vst [vmem:[%s1912_s4 + $0xf0] sm:$0xff] %v389_v48 }
 0x10f   :  { %1119 = vst [vmem:[%s1912_s4 + $0x1e0] sm:$0xff] %v842_v55 }
 0x110   :  { %1120 = vst.msk [vmem:[%s1912_s4 + $0x1e8] sm:$0xff] %vm457_vm2, %v907_v49 }
 0x111   :  { %488 = vst.msk [vmem:[%s1912_s4 + $0xf8] sm:$0xff] %vm457_vm2, %v454_v10 }
 0x114   :  { %v844_v43 = vpop.f32.mrf.mxu2  ;;  %v909_v6 = vpop.f32.mrf.mxu3 }
 0x115   :  { %v845_v50 = vadd.f32 %v844_v43, %v726_v7  ;;  %v910_v51 = vadd.f32 %v909_v6, %v726_v7 }
 0x117   :  { %1121 = vst [vmem:[%s1912_s4 + $0x1f0] sm:$0xff] %v845_v50 }
 0x118   :  { %1122 = vst.msk [vmem:[%s1912_s4 + $0x1f8] sm:$0xff] %vm457_vm2, %v910_v51 }
 0x119   :  { %949 = vsyncpa [#allocation3], 1 }

</bundles_post_ra>
